<compile_context>
chip_gen: v7x
topology: tpu7x:2x2x1
jax: 0.10.0
libtpu: 0.0.40
codegen_flags: <defaults>
</compile_context>

<pallas_src>
import functools

import jax
import jax.numpy as jnp
from jax.experimental import pallas as pl
from jax.experimental.pallas import tpu as pltpu

_LANE = 128


def multi_sample_fc_kernel(x_ref, cnt_ref, w_ref, b_ref, o_ref, *, inv_heads):
    """x_ref, cnt_ref: (C_in, tm); w_ref: (C_out, C_in); b_ref: (C_out, 1);
    o_ref: (C_out, tm).  M is on the 128-lane axis everywhere."""
    avg_mask = cnt_ref[...] * inv_heads                       # Binomial/heads, VPU
    masked = x_ref[...].astype(jnp.float32) * avg_mask        # VPU
    out = jnp.dot(w_ref[...].astype(jnp.float32), masked,     # single MXU pass
                  preferred_element_type=jnp.float32)
    o_ref[...] = (out + b_ref[...].astype(jnp.float32)).astype(o_ref.dtype)


def multi_sample_fc(x_ncl, w_oc1, b_o, *, heads=8, dropout_rate=0.2,
                    rng_key=None, tm=1024):
    """x_ncl: (N, C_in, L)  [PyTorch Conv1d layout]
       w_oc1: (C_out, C_in, 1) Conv1d weight; b_o: (C_out,) bias."""
    N, C_in, L = x_ncl.shape
    C_out = w_oc1.shape[0]
    M = N * L
    keep_prob = 1.0 - dropout_rate
    if rng_key is None:
        rng_key = jax.random.PRNGKey(0)

    # Channels-first 2D views (lane-dense along M).
    x2d = jnp.transpose(x_ncl, (1, 0, 2)).reshape(C_in, M)    # (C_in, M)
    w = w_oc1[:, :, 0]                                        # (C_out, C_in)
    b = b_o.reshape(C_out, 1)                                 # (C_out, 1)

    # Sum of `heads` independent Bernoulli(keep_prob) masks per element
    # (= Binomial(heads, keep_prob) count).
    counts = jax.random.bernoulli(
        rng_key, keep_prob, (heads, C_in, M)).astype(jnp.float32).sum(axis=0)

    # Pad M to a multiple of the lane width (and of the tile) -> unmasked vst.
    m_pad = pl.cdiv(M, _LANE) * _LANE
    tm = min(tm, m_pad)
    m_pad = pl.cdiv(m_pad, tm) * tm
    if m_pad != M:
        pad = ((0, 0), (0, m_pad - M))
        x2d = jnp.pad(x2d, pad)
        counts = jnp.pad(counts, pad)

    kernel = functools.partial(multi_sample_fc_kernel, inv_heads=1.0 / heads)

    out2d = pl.pallas_call(
        kernel,
        out_shape=jax.ShapeDtypeStruct((C_out, m_pad), x_ncl.dtype),
        grid_spec=pltpu.PrefetchScalarGridSpec(
            num_scalar_prefetch=0,
            grid=(m_pad // tm,),
            in_specs=[
                pl.BlockSpec((C_in, tm), lambda i: (0, i)),    # x tile
                pl.BlockSpec((C_in, tm), lambda i: (0, i)),    # mask counts tile
                pl.BlockSpec((C_out, C_in), lambda i: (0, 0)),  # weight (resident)
                pl.BlockSpec((C_out, 1), lambda i: (0, 0)),     # bias   (resident)
            ],
            out_specs=pl.BlockSpec((C_out, tm), lambda i: (0, i)),
        ),
        compiler_params=pltpu.CompilerParams(
            dimension_semantics=("parallel",),
            vmem_limit_bytes=32 << 20,   # fits comfortably on v7x's 64 MiB VMEM
        ),
    )(x2d, counts, w, b)

    out2d = out2d[:, :M]                                       # drop lane padding
    return jnp.transpose(out2d.reshape(C_out, N, L), (1, 0, 2))  # (N, C_out, L)


if __name__ == "__main__":
    # Module config (small): heads=8, dropout_rate=0.2,
    # in_channels=4, out_channels=8; input (batch=2, in_channels=4, seq=16).
    heads = 8
    dropout_rate = 0.2
    in_channels, out_channels = 4, 8
    N, L = 2, 16

    key = jax.random.PRNGKey(0)
    kx, kw, kb, kmask = jax.random.split(key, 4)

    x = jax.random.normal(kx, (N, in_channels, L), dtype=jnp.float32)
    # Deterministic Conv1d parameter init (PyTorch shapes: (C_out, C_in, 1), (C_out,)).
    fan_in = in_channels * 1
    bound = 1.0 / (fan_in ** 0.5)
    w = jax.random.uniform(kw, (out_channels, in_channels, 1),
                           minval=-bound, maxval=bound, dtype=jnp.float32)
    b = jax.random.uniform(kb, (out_channels,),
                           minval=-bound, maxval=bound, dtype=jnp.float32)

    out = multi_sample_fc(x, w, b, heads=heads, dropout_rate=dropout_rate,
                          rng_key=kmask)
    out = jax.block_until_ready(out)

    assert out.shape == (N, out_channels, L), out.shape
    assert jnp.isfinite(out).all()

    # Pure-JAX reference with the identical mask draw (same key/shape/prob).
    M = N * L
    x2d = jnp.transpose(x, (1, 0, 2)).reshape(in_channels, M)
    counts = jax.random.bernoulli(
        kmask, 1.0 - dropout_rate,
        (heads, in_channels, M)).astype(jnp.float32).sum(axis=0)
    ref2d = w[:, :, 0] @ (x2d * counts / heads) + b[:, None]
    ref = jnp.transpose(ref2d.reshape(out_channels, N, L), (1, 0, 2))
    assert jnp.allclose(out, ref, rtol=1e-5, atol=1e-5)

    print("KERNEL_OK")
</pallas_src>

<mosaic_0001>
module attributes {stable_mosaic.version = 11 : i64} {
  func.func @multi_sample_fc_kernel(%arg0: i32, %arg1: memref<4x128xf32, #tpu.memory_space<vmem>>, %arg2: memref<4x128xf32, #tpu.memory_space<vmem>>, %arg3: memref<8x4xf32, #tpu.memory_space<vmem>>, %arg4: memref<8x1xf32, #tpu.memory_space<vmem>>, %arg5: memref<8x128xf32, #tpu.memory_space<vmem>>) attributes {dimension_semantics = [#tpu.dimension_semantics<parallel>], iteration_bounds = array<i64: 1>, scalar_prefetch = 0 : i64, scratch_operands = 0 : i64, tpu.core_type = #tpu.core_type<tc>, window_params = [{transform_indices = @transform_0, window_bounds = array<i64: 4, 128>}, {transform_indices = @transform_1, window_bounds = array<i64: 4, 128>}, {pipeline_mode = #tpu.pipeline_mode<synchronous>, transform_indices = @transform_2, window_bounds = array<i64: 8, 4>}, {pipeline_mode = #tpu.pipeline_mode<synchronous>, transform_indices = @transform_3, window_bounds = array<i64: 8, 1>}, {transform_indices = @transform_4, window_bounds = array<i64: 8, 128>}]} {
    %c0 = arith.constant 0 : index
    %c0_0 = arith.constant 0 : index
    %0 = vector.load %arg2[%c0, %c0_0] : memref<4x128xf32, #tpu.memory_space<vmem>>, vector<4x128xf32>
    %cst = arith.constant 1.250000e-01 : f32
    %1 = vector.broadcast %cst : f32 to vector<4x128xf32>
    %2 = arith.mulf %0, %1 : vector<4x128xf32>
    %c0_1 = arith.constant 0 : index
    %c0_2 = arith.constant 0 : index
    %3 = vector.load %arg1[%c0_1, %c0_2] : memref<4x128xf32, #tpu.memory_space<vmem>>, vector<4x128xf32>
    %4 = arith.mulf %3, %2 : vector<4x128xf32>
    %c0_3 = arith.constant 0 : index
    %c0_4 = arith.constant 0 : index
    %5 = vector.load %arg3[%c0_3, %c0_4] : memref<8x4xf32, #tpu.memory_space<vmem>>, vector<8x4xf32>
    %cst_5 = arith.constant dense<0.000000e+00> : vector<8x128xf32>
    %6 = tpu.matmul %5, %4, %cst_5 {dimension_numbers = #tpu.dot_dimension_numbers<[1], [0], [0], [1], [0, 0, 1, 1], [], []>} : vector<8x4xf32>, vector<4x128xf32>, vector<8x128xf32> -> vector<8x128xf32>
    %c0_6 = arith.constant 0 : index
    %c0_7 = arith.constant 0 : index
    %7 = vector.load %arg4[%c0_6, %c0_7] : memref<8x1xf32, #tpu.memory_space<vmem>>, vector<8x1xf32>
    %8 = vector.broadcast %7 : vector<8x1xf32> to vector<8x128xf32>
    %9 = arith.addf %6, %8 : vector<8x128xf32>
    %c0_8 = arith.constant 0 : index
    %c0_9 = arith.constant 0 : index
    %10 = vector.load %arg5[%c0_8, %c0_9] : memref<8x128xf32, #tpu.memory_space<vmem>>, vector<8x128xf32>
    tpu.vector_store %arg5[%c0_8, %c0_9], %9 {strides = array<i32>} : memref<8x128xf32, #tpu.memory_space<vmem>>, vector<8x128xf32>,
    return
  }
  func.func @transform_0(%arg0: i32) -> (i32, i32) {
    %c0_i32 = arith.constant 0 : i32
    %c0_i32_0 = arith.constant 0 : i32
    return %c0_i32, %arg0 : i32, i32
  }
  func.func @transform_1(%arg0: i32) -> (i32, i32) {
    %c0_i32 = arith.constant 0 : i32
    %c0_i32_0 = arith.constant 0 : i32
    return %c0_i32, %arg0 : i32, i32
  }
  func.func @transform_2(%arg0: i32) -> (i32, i32) {
    %c0_i32 = arith.constant 0 : i32
    %c0_i32_0 = arith.constant 0 : i32
    %c0_i32_1 = arith.constant 0 : i32
    return %c0_i32, %c0_i32_0 : i32, i32
  }
  func.func @transform_3(%arg0: i32) -> (i32, i32) {
    %c0_i32 = arith.constant 0 : i32
    %c0_i32_0 = arith.constant 0 : i32
    %c0_i32_1 = arith.constant 0 : i32
    return %c0_i32, %c0_i32_0 : i32, i32
  }
  func.func @transform_4(%arg0: i32) -> (i32, i32) {
    %c0_i32 = arith.constant 0 : i32
    %c0_i32_0 = arith.constant 0 : i32
    return %c0_i32, %arg0 : i32, i32
  }
}

</mosaic_0001>

<bundles_post_ra>
// kernel: tpu_custom_call.1
= control target key start
LH: loop header
LB: loop body
LE: loop exit
PB: predicated region body
PF: predicated region fallthrough
CT: control target
= control target key end

     0   :  { %v160_v2 = vmov 0.0   ;;  %vm33_vm0 = vcmask 1043456   ;;  %vm161_vm1 = vmmov 0   ;;  %v162_v5 = vmov 0   ;;  %s213_s0 = inlined_call_operand.vmem [shape: f32[4,128], index: 0, kind: input, shape index: {}]   ;;  %s214_s1 = inlined_call_operand.vmem [shape: f32[4,128], index: 1, kind: input, shape index: {}]   ;;  %s215_s2 = inlined_call_operand.vmem [shape: f32[8,4], index: 2, kind: input, shape index: {}]   ;;  %s216_s3 = inlined_call_operand.vmem [shape: f32[8,1], index: 3, kind: input, shape index: {}]   ;;  %s217_s4 = inlined_call_operand.hbm [shape: f32[8,128], index: 4, kind: output, shape index: {}]  }
   0x1   :  { %v18_v0 = vld [vmem:[%s214_s1] sm:$0xf]  ;;  %126 = vmatprep.subr.mxu0 %v160_v2  ;;  %128 = vmatprep.mubr.msk.f32.mxu0 %vm161_vm1, %v160_v2 }
   0x2   :  { %v20_v1 = vld [vmem:[%s213_s0] sm:$0xf]  ;;  %v19_v3 = vmul.f32 0.125, %v18_v0  ;;  %135 = vset.pattern.permute.xlu0 %v162_v5 }
   0x3   :  { %v23_v4 = vld [vmem:[%s216_s3] sm:$0xff] }
   0x4   :  { %9 = vsyncpa [#allocation3], 0  ;;  %v21_v6 = vmul.f32 %v20_v1, %v19_v3  ;;  %v22_v7 = vld [vmem:[%s215_s2] sm:$0xff]  ;;  %vm29_vm2 = vcmask 31744   ;;  %26 = vperm.xlu0 %135, %v23_v4   ;;  %s163_s0 = smov [#allocation2]  }
   0x5   :  { %s114_s22 = sshll.u32 %s163_s0, 4  ;;  %s115_s22 = int_to_ptr.vmem [resolvable:$true] %s114_s22 }
   0x6   :  { %127 = vmatpush3.msk.msra.mxu0 %vm33_vm0, %v21_v6  ;;  %s136_s3 = scalar_lea.vmem %s115_s22, 128  ;;  %p141_p1 = scmp.lt.s32.totalorder %s115_s22, %s115_s22 }
   0x7   :  { %129 = vmatmul.mubr.msk.f32.vlgmr.msra.gmra.mrb[0].mxu0 %vm29_vm2, %v22_v7  ;;  %p137_p0 = scmp.ne.s32.totalorder %s115_s22, %s136_s3  ;;  %p142_p2 = scmp.lt.s32.totalorder %s136_s3, %s136_s3 }
   0x9   :  { %p143_p3 = por %p142_p2, %p141_p1 }
   0xb   :  { %p144_p4 = pnand %p143_p3, %p137_p0 }
  0x83   :  { %v27_v8 = vpop.permute.xlu0 %26 }
  0xda   :  { %v103_v9 = vpop.f32.mrb[0].mxu0 }
  0xdb   :  { %v104_v10 = vadd.f32 %v103_v9, %v27_v8  ;;  %v130_v11 = vpop.f32.mrb[1].mxu0 }
  0xdd   :  { %107 = vst [vmem:[#allocation2] sm:$0xff] %v104_v10 }
  0xde   :  { %147 = shalt.err (!%p144_p4)
}
  0xdf   :  { %s148_s24 = scalar_lea.hbm %s217_s4, 128 }
  0xe0   :  { %p149_p5 = scmp.ne.s32.totalorder %s217_s4, %s148_s24  ;;  %p152_p6 = scmp.lt.u32.totalorder %s148_s24, %s217_s4 }
  0xe2   :  { %p154_p7 = pnand %p152_p6, %p149_p5 }
  0xe4   :  { %157 = shalt.err (!%p154_p7)
}
  0xe5   :  { %117 = dma.vmem_to_hbm [thread:$0]  %s115_s22, 128, %s217_s4, [#allocation3]  }
  0xe6   :  { %158 = dma.done.wait [#allocation3], 128  }
  0xe7   :  { %159 = vsyncadd [#allocation3], 4294967168 }
  0xe8   :  { %121 = vsyncpa [#allocation3], 1 }

</bundles_post_ra>
